<compile_context>
chip_gen: v6e
topology: v6e:2x2x1
jax: 0.10.0
libtpu: 0.0.40
codegen_flags: <defaults>
</compile_context>

<pallas_src>
import functools

import jax
import jax.numpy as jnp
from jax import lax
from jax.experimental import pallas as pl
from jax.experimental.pallas import tpu as pltpu

_LANES = 128
_SUBLANES = 8
_MAX_TILE_ROWS = 2048   # 2048 x 128 f32 = 1 MiB per input per block
_NCORES = 2             # split row range across 2 TCs on v7x; no-op elsewhere


def _focal_sum_kernel(x_ref, t_ref, out_ref, acc_ref, *,
                      alpha, gamma, n_valid, tile_rows, steps_per_core,
                      needs_mask):
    c = pl.program_id(0)          # "parallel" (core) axis
    i = pl.program_id(1)          # sequential reduction axis

    @pl.when(i == 0)
    def _():
        acc_ref[...] = jnp.zeros_like(acc_ref)

    x = x_ref[...].astype(jnp.float32)   # logits
    t = t_ref[...].astype(jnp.float32)   # targets in [0, 1]

    # BCE with logits: identical to -(t*log(sigmoid(x)) + (1-t)*log(1-sigmoid(x)))
    # but numerically stable and only ~3 transcendentals per element.
    e = jnp.exp(-jnp.abs(x))
    bce = jnp.maximum(x, 0.0) - x * t + jnp.log(1.0 + e)
    # torch BCELoss clamps the log terms at -100; for binary targets that is
    # equivalent to clamping the per-element loss at 100.
    bce = jnp.minimum(bce, 100.0)

    pt = jnp.exp(-bce)
    omp = 1.0 - pt
    if gamma == 2.0:
        w = omp * omp
    elif gamma == 1.0:
        w = omp
    elif gamma == 0.0:
        w = jnp.ones_like(omp)
    else:
        w = jnp.power(omp, jnp.float32(gamma))
    focal = w * bce
    if alpha != 1.0:
        focal = jnp.float32(alpha) * focal

    if needs_mask:
        # Mask padding / out-of-range rows of the (possibly clamped) block.
        block = c * steps_per_core + i
        start_row = block * tile_rows
        row_ids = start_row + lax.broadcasted_iota(
            jnp.int32, (tile_rows, _LANES), 0)
        if n_valid % _LANES == 0:
            mask = row_ids < (n_valid // _LANES)
        else:
            col_ids = lax.broadcasted_iota(jnp.int32, (tile_rows, _LANES), 1)
            mask = (row_ids * _LANES + col_ids) < n_valid
        focal = jnp.where(mask, focal, 0.0)

    acc_ref[...] += focal

    @pl.when(i == pl.num_programs(1) - 1)
    def _():
        out_ref[...] = jnp.sum(acc_ref[...], axis=0,
                               keepdims=True).reshape(1, 1, _LANES)


def focal_loss(inputs, targets, alpha=1.0, gamma=2.0):
    """JAX/Pallas equivalent of FocalLoss.forward (inputs are logits)."""
    assert inputs.shape == targets.shape, (inputs.shape, targets.shape)
    n = int(inputs.size)

    x_flat = inputs.reshape(-1)          # keep native dtype; cast in-kernel
    t_flat = targets.reshape(-1)

    chunk = _SUBLANES * _LANES
    pad = (-n) % chunk                   # only materialize a copy when needed
    if pad:
        x_flat = jnp.pad(x_flat, (0, pad))
        t_flat = jnp.pad(t_flat, (0, pad))
    rows = (n + pad) // _LANES

    x2 = x_flat.reshape(rows, _LANES)
    t2 = t_flat.reshape(rows, _LANES)

    tile_rows = min(_MAX_TILE_ROWS, rows)
    nblocks = -(-rows // tile_rows)
    ncores = max(1, min(_NCORES, nblocks))
    steps = -(-nblocks // ncores)

    # Exact tiling => every element of every block is valid => skip the mask.
    needs_mask = not (pad == 0 and rows % tile_rows == 0
                      and nblocks % ncores == 0)

    def in_map(c, i):
        # Clamp so DMAs of the (rare) overhanging blocks stay in bounds; their
        # contribution is zeroed by the in-kernel mask.
        return (jnp.minimum(c * steps + i, nblocks - 1), 0)

    kernel = functools.partial(
        _focal_sum_kernel,
        alpha=float(alpha), gamma=float(gamma),
        n_valid=n, tile_rows=tile_rows, steps_per_core=steps,
        needs_mask=needs_mask)

    partials = pl.pallas_call(
        kernel,
        out_shape=jax.ShapeDtypeStruct((ncores, 1, _LANES), jnp.float32),
        grid_spec=pltpu.PrefetchScalarGridSpec(
            num_scalar_prefetch=0,
            grid=(ncores, steps),
            in_specs=[pl.BlockSpec((tile_rows, _LANES), in_map),
                      pl.BlockSpec((tile_rows, _LANES), in_map)],
            out_specs=pl.BlockSpec((1, 1, _LANES), lambda c, i: (c, 0, 0)),
            scratch_shapes=[pltpu.VMEM((tile_rows, _LANES), jnp.float32)],
        ),
        compiler_params=pltpu.CompilerParams(
            dimension_semantics=("parallel", "arbitrary")),
    )(x2, t2)

    return jnp.sum(partials) / jnp.float32(n)


def _reference_focal_loss(inputs, targets, alpha=1.0, gamma=2.0):
    # Plain-JAX transcription of the PyTorch module (p-space BCE with torch's
    # log clamp at -100).
    p = jax.nn.sigmoid(inputs.astype(jnp.float32)).reshape(-1)
    t = targets.astype(jnp.float32).reshape(-1)
    log_p = jnp.maximum(jnp.log(p), -100.0)
    log_1mp = jnp.maximum(jnp.log(1.0 - p), -100.0)
    bce = -(t * log_p + (1.0 - t) * log_1mp)
    pt = jnp.exp(-bce)
    focal = alpha * (1.0 - pt) ** gamma * bce
    return jnp.mean(focal)


if __name__ == "__main__":
    key = jax.random.PRNGKey(0)
    k1, k2 = jax.random.split(key)
    # Small NCHW shapes: batch=2, channels=4, spatial=16x16.
    x = jax.random.normal(k1, (2, 4, 16, 16), dtype=jnp.float32)
    t = jax.random.bernoulli(k2, p=0.3, shape=(2, 4, 16, 16)).astype(jnp.float32)

    loss = jax.block_until_ready(focal_loss(x, t))
    ref = jax.block_until_ready(_reference_focal_loss(x, t))

    assert jnp.isfinite(loss), loss
    assert abs(float(loss) - float(ref)) < 1e-4, (float(loss), float(ref))
    print("KERNEL_OK")
</pallas_src>

<mosaic_0001>
module attributes {stable_mosaic.version = 11 : i64} {
  func.func @_focal_sum_kernel(%arg0: i32, %arg1: i32, %arg2: memref<16x128xf32, #tpu.memory_space<vmem>>, %arg3: memref<16x128xf32, #tpu.memory_space<vmem>>, %arg4: memref<1x1x128xf32, #tpu.memory_space<vmem>>, %arg5: memref<16x128xf32, #tpu.memory_space<vmem>>) attributes {dimension_semantics = [#tpu.dimension_semantics<parallel>, #tpu.dimension_semantics<arbitrary>], iteration_bounds = array<i64: 1, 1>, scalar_prefetch = 0 : i64, scratch_operands = 1 : i64, tpu.core_type = #tpu.core_type<tc>, window_params = [{transform_indices = @transform_0, window_bounds = array<i64: 16, 128>}, {transform_indices = @transform_1, window_bounds = array<i64: 16, 128>}, {transform_indices = @transform_2, window_bounds = array<i64: 1, 1, 128>}]} {
    %c0_i32 = arith.constant 0 : i32
    %0 = arith.cmpi eq, %arg1, %c0_i32 : i32
    %1 = arith.extui %0 : i1 to i32
    %c0_i32_0 = arith.constant 0 : i32
    %2 = arith.cmpi ne, %1, %c0_i32_0 : i32
    scf.if %2 {
      %cst_15 = arith.constant 0.000000e+00 : f32
      %32 = vector.broadcast %cst_15 : f32 to vector<16x128xf32>
      %c0_16 = arith.constant 0 : index
      %c0_17 = arith.constant 0 : index
      %33 = vector.load %arg5[%c0_16, %c0_17] : memref<16x128xf32, #tpu.memory_space<vmem>>, vector<16x128xf32>
      tpu.vector_store %arg5[%c0_16, %c0_17], %32 {strides = array<i32>} : memref<16x128xf32, #tpu.memory_space<vmem>>, vector<16x128xf32>,
    } else {
    }
    %c0 = arith.constant 0 : index
    %c0_1 = arith.constant 0 : index
    %3 = vector.load %arg2[%c0, %c0_1] : memref<16x128xf32, #tpu.memory_space<vmem>>, vector<16x128xf32>
    %c0_2 = arith.constant 0 : index
    %c0_3 = arith.constant 0 : index
    %4 = vector.load %arg3[%c0_2, %c0_3] : memref<16x128xf32, #tpu.memory_space<vmem>>, vector<16x128xf32>
    %5 = math.absf %3 : vector<16x128xf32>
    %cst = arith.constant 0.000000e+00 : f32
    %6 = vector.broadcast %cst : f32 to vector<16x128xf32>
    %7 = arith.subf %6, %5 : vector<16x128xf32>
    %8 = math.exp %7 : vector<16x128xf32>
    %cst_4 = arith.constant 0.000000e+00 : f32
    %9 = vector.broadcast %cst_4 : f32 to vector<16x128xf32>
    %10 = arith.maximumf %3, %9 : vector<16x128xf32>
    %11 = arith.mulf %3, %4 : vector<16x128xf32>
    %12 = arith.subf %10, %11 : vector<16x128xf32>
    %cst_5 = arith.constant 1.000000e+00 : f32
    %13 = vector.broadcast %cst_5 : f32 to vector<16x128xf32>
    %14 = arith.addf %13, %8 : vector<16x128xf32>
    %15 = math.log %14 : vector<16x128xf32>
    %16 = arith.addf %12, %15 : vector<16x128xf32>
    %cst_6 = arith.constant 1.000000e+02 : f32
    %17 = vector.broadcast %cst_6 : f32 to vector<16x128xf32>
    %18 = arith.minimumf %16, %17 : vector<16x128xf32>
    %cst_7 = arith.constant 0.000000e+00 : f32
    %19 = vector.broadcast %cst_7 : f32 to vector<16x128xf32>
    %20 = arith.subf %19, %18 : vector<16x128xf32>
    %21 = math.exp %20 : vector<16x128xf32>
    %cst_8 = arith.constant 1.000000e+00 : f32
    %22 = vector.broadcast %cst_8 : f32 to vector<16x128xf32>
    %23 = arith.subf %22, %21 : vector<16x128xf32>
    %24 = arith.mulf %23, %23 : vector<16x128xf32>
    %25 = arith.mulf %24, %18 : vector<16x128xf32>
    %c0_9 = arith.constant 0 : index
    %c0_10 = arith.constant 0 : index
    %26 = vector.load %arg5[%c0_9, %c0_10] : memref<16x128xf32, #tpu.memory_space<vmem>>, vector<16x128xf32>
    %27 = arith.addf %26, %25 : vector<16x128xf32>
    %c0_11 = arith.constant 0 : index
    %c0_12 = arith.constant 0 : index
    %28 = vector.load %arg5[%c0_11, %c0_12] : memref<16x128xf32, #tpu.memory_space<vmem>>, vector<16x128xf32>
    tpu.vector_store %arg5[%c0_11, %c0_12], %27 {strides = array<i32>} : memref<16x128xf32, #tpu.memory_space<vmem>>, vector<16x128xf32>,
    %c0_i32_13 = arith.constant 0 : i32
    %29 = arith.cmpi eq, %arg1, %c0_i32_13 : i32
    %30 = arith.extui %29 : i1 to i32
    %c0_i32_14 = arith.constant 0 : i32
    %31 = arith.cmpi ne, %30, %c0_i32_14 : i32
    scf.if %31 {
      %c0_15 = arith.constant 0 : index
      %c0_16 = arith.constant 0 : index
      %32 = vector.load %arg5[%c0_15, %c0_16] : memref<16x128xf32, #tpu.memory_space<vmem>>, vector<16x128xf32>
      %cst_17 = arith.constant dense<0.000000e+00> : vector<128xf32>
      %33 = vector.multi_reduction <add>, %32, %cst_17 [0] : vector<16x128xf32> to vector<128xf32>
      %34 = vector.shape_cast %33 : vector<128xf32> to vector<1x128xf32>
      %35 = vector.shape_cast %34 : vector<1x128xf32> to vector<1x1x128xf32>
      %c0_18 = arith.constant 0 : index
      %c0_19 = arith.constant 0 : index
      %c0_20 = arith.constant 0 : index
      %36 = vector.load %arg4[%c0_18, %c0_19, %c0_20] : memref<1x1x128xf32, #tpu.memory_space<vmem>>, vector<1x1x128xf32>
      tpu.vector_store %arg4[%c0_18, %c0_19, %c0_20], %35 {strides = array<i32>} : memref<1x1x128xf32, #tpu.memory_space<vmem>>, vector<1x1x128xf32>,
    } else {
    }
    return
  }
  func.func @transform_0(%arg0: i32, %arg1: i32) -> (i32, i32) {
    %c1_i32 = arith.constant 1 : i32
    %0 = arith.muli %arg0, %c1_i32 : i32
    %1 = arith.addi %0, %arg1 : i32
    %c0_i32 = arith.constant 0 : i32
    %2 = arith.minsi %1, %c0_i32 : i32
    %c0_i32_0 = arith.constant 0 : i32
    %c0_i32_1 = arith.constant 0 : i32
    return %2, %c0_i32_0 : i32, i32
  }
  func.func @transform_1(%arg0: i32, %arg1: i32) -> (i32, i32) {
    %c1_i32 = arith.constant 1 : i32
    %0 = arith.muli %arg0, %c1_i32 : i32
    %1 = arith.addi %0, %arg1 : i32
    %c0_i32 = arith.constant 0 : i32
    %2 = arith.minsi %1, %c0_i32 : i32
    %c0_i32_0 = arith.constant 0 : i32
    %c0_i32_1 = arith.constant 0 : i32
    return %2, %c0_i32_0 : i32, i32
  }
  func.func @transform_2(%arg0: i32, %arg1: i32) -> (i32, i32, i32) {
    %c0_i32 = arith.constant 0 : i32
    %c0_i32_0 = arith.constant 0 : i32
    %c0_i32_1 = arith.constant 0 : i32
    return %arg0, %c0_i32, %c0_i32_0 : i32, i32, i32
  }
}

</mosaic_0001>

<bundles_post_ra>
// kernel: tpu_custom_call.1
= control target key start
LH: loop header
LB: loop body
LE: loop exit
PB: predicated region body
PF: predicated region fallthrough
CT: control target
= control target key end

     0   :  { %7 = vsyncpa [#allocation4], 0  ;;  %s257_s0 = inlined_call_operand.hbm [shape: f32[16,128], index: 0, kind: input, shape index: {}]   ;;  %s258_s1 = inlined_call_operand.hbm [shape: f32[16,128], index: 1, kind: input, shape index: {}]   ;;  %s259_s2 = inlined_call_operand.hbm [shape: f32[1,1,128], index: 2, kind: output, shape index: {}]  }
   0x1   :  { %8 = vsyncpa [#allocation7], 0 }
   0x2   :  { %9 = vsyncpa [#allocation5], 0  ;;  %s228_s9 = smov [#allocation3]  }
   0x3   :  { %s21_s10 = sshll.u32 %s228_s9, 4  ;;  %s22_s10 = int_to_ptr.vmem [resolvable:$true] %s21_s10 }
   0x4   :  { %s170_s11 = scalar_lea.vmem %s22_s10, 256  ;;  %p175_p1 = scmp.lt.s32.totalorder %s22_s10, %s22_s10 }
   0x5   :  { %p171_p0 = scmp.ne.s32.totalorder %s22_s10, %s170_s11  ;;  %p176_p2 = scmp.lt.s32.totalorder %s170_s11, %s170_s11 }
   0x7   :  { %p177_p3 = por %p176_p2, %p175_p1 }
   0x9   :  { %p178_p4 = pnand %p177_p3, %p171_p0 }
   0xb   :  { %181 = shalt.err (!%p178_p4)
}
   0xc   :  { %s229_s12 = smov 128   ;;  %s230_s13 = smov 8  }
   0xd   :  { %27 = dma.hbm_to_vmem [thread:$0]  %s257_s0, 256, %s22_s10, [#allocation4], %s229_s12, %s229_s12, %s230_s13  }
   0xe   :  { %s231_s16 = smov [#allocation6]  }
   0xf   :  { %s39_s17 = sshll.u32 %s231_s16, 4  ;;  %s40_s17 = int_to_ptr.vmem [resolvable:$true] %s39_s17 }
  0x10   :  { %s190_s18 = scalar_lea.vmem %s40_s17, 256  ;;  %p195_p6 = scmp.lt.s32.totalorder %s40_s17, %s40_s17 }
  0x11   :  { %p191_p5 = scmp.ne.s32.totalorder %s40_s17, %s190_s18  ;;  %p196_p7 = scmp.lt.s32.totalorder %s190_s18, %s190_s18 }
  0x13   :  { %p197_p8 = por %p196_p7, %p195_p6 }
  0x15   :  { %p198_p9 = pnand %p197_p8, %p191_p5 }
  0x17   :  { %201 = shalt.err (!%p198_p9)
}
  0x18   :  { %45 = dma.hbm_to_vmem [thread:$0]  %s258_s1, 256, %s40_s17, [#allocation7], %s229_s12, %s229_s12, %s230_s13  }
  0x19   :  { %222 = dma.done.wait [#allocation4], 256  }
  0x1a   :  { %223 = vsyncadd [#allocation4], 4294967040 }
  0x1b   :  { %224 = dma.done.wait [#allocation7], 256  }
  0x1c   :  { %225 = vsyncadd [#allocation7], 4294967040  ;;  %v66_v0 = vld [vmem:[#allocation3] sm:$0xff]  ;;  %v67_v1 = vld [vmem:[#allocation3 + $0x8] sm:$0xff]  ;;  %s232_s0 = smov [#allocation8]  }
  0x1d   :  { %v70_v2 = vand.u32 2147483647, %v66_v0  ;;  %v71_v3 = vand.u32 2147483647, %v67_v1  ;;  %v68_v12 = vld [vmem:[#allocation6] sm:$0xff]  ;;  %v69_v13 = vld [vmem:[#allocation6 + $0x8] sm:$0xff] }
  0x1e   :  { %v78_v14 = vmax.f32 %v66_v0, 0.0  ;;  %v80_v15 = vmul.f32 %v68_v12, %v66_v0  ;;  %v79_v16 = vmax.f32 %v67_v1, 0.0  ;;  %v81_v17 = vmul.f32 %v69_v13, %v67_v1  ;;  %s131_s1 = sshll.u32 %s232_s0, 4  ;;  %s132_s1 = int_to_ptr.vmem [resolvable:$true] %s131_s1 }
  0x1f   :  { %v72_v4 = vsub.f32 0.0, %v70_v2  ;;  %v73_v5 = vsub.f32 0.0, %v71_v3  ;;  %s202_s21 = scalar_lea.vmem %s132_s1, 16  ;;  %s206_s22 = scalar_lea.vmem %s132_s1, 32 }
  0x20   :  { %v82_v18 = vsub.f32 %v78_v14, %v80_v15  ;;  %v83_v20 = vsub.f32 %v79_v16, %v81_v17  ;;  %p203_p10 = scmp.ne.s32.totalorder %s132_s1, %s202_s21  ;;  %p207_p11 = scmp.lt.s32.totalorder %s132_s1, %s132_s1 }
  0x21   :  { %v74_v6 = vmul.f32 1.442695, %v72_v4  ;;  %v76_v7 = vmul.f32 1.442695, %v73_v5  ;;  %p208_p12 = scmp.lt.s32.totalorder %s206_s22, %s202_s21 }
  0x23   :  { %150 = vpow2.f32 %v74_v6  ;;  %p209_p13 = por %p208_p12, %p207_p11 }
  0x24   :  { %152 = vpow2.f32 %v76_v7 }
  0x25   :  { %p210_p0 = pnand %p209_p13, %p203_p10 }
  0x30   :  { %v151_v8 = vpop.eup %150 }
  0x31   :  { %v153_v9 = vpop.eup %152  ;;  %v84_v10 = vadd.f32 1.0, %v151_v8 }
  0x32   :  { %v85_v11 = vadd.f32 1.0, %v153_v9 }
  0x33   :  { %154 = vlog2.f32 %v84_v10 }
  0x34   :  { %156 = vlog2.f32 %v85_v11 }
  0x40   :  { %v155_v19 = vpop.eup %154 }
  0x41   :  { %v157_v21 = vpop.eup %156  ;;  %v87_v22 = vmul.f32 0.6931472, %v155_v19 }
  0x42   :  { %v89_v23 = vmul.f32 0.6931472, %v157_v21 }
  0x43   :  { %v90_v24 = vadd.f32 %v87_v22, %v82_v18 }
  0x44   :  { %v91_v25 = vadd.f32 %v89_v23, %v83_v20 }
  0x45   :  { %v92_v26 = vmin.f32 %v90_v24, 100.0 }
  0x46   :  { %v93_v27 = vmin.f32 %v91_v25, 100.0 }
  0x47   :  { %v94_v28 = vsub.f32 0.0, %v92_v26 }
  0x48   :  { %v95_v29 = vsub.f32 0.0, %v93_v27 }
  0x49   :  { %v96_v30 = vmul.f32 1.442695, %v94_v28 }
  0x4a   :  { %v98_v31 = vmul.f32 1.442695, %v95_v29 }
  0x4b   :  { %158 = vpow2.f32 %v96_v30 }
  0x4c   :  { %160 = vpow2.f32 %v98_v31 }
  0x58   :  { %v159_v32 = vpop.eup %158 }
  0x59   :  { %v161_v33 = vpop.eup %160  ;;  %v100_v34 = vsub.f32 1.0, %v159_v32 }
  0x5a   :  { %v101_v35 = vsub.f32 1.0, %v161_v33 }
  0x5b   :  { %v102_v36 = vmul.f32 %v100_v34, %v100_v34 }
  0x5c   :  { %v103_v37 = vmul.f32 %v101_v35, %v101_v35 }
  0x5d   :  { %v104_v38 = vmul.f32 %v102_v36, %v92_v26 }
  0x5e   :  { %v105_v39 = vmul.f32 %v103_v37, %v93_v27 }
  0x60   :  { %v117_v40 = vadd.f32 %v105_v39, %v104_v38 }
  0x62   :  { %v118_v41 = vrot.slane %v117_v40, 4 }
  0x64   :  { %v119_v42 = vadd.f32 %v118_v41, %v117_v40 }
  0x66   :  { %v120_v43 = vrot.slane %v119_v42, 2 }
  0x68   :  { %v121_v44 = vadd.f32 %v120_v43, %v119_v42 }
  0x6a   :  { %v122_v45 = vrot.slane %v121_v44, 1 }
  0x6c   :  { %v123_v46 = vadd.f32 %v122_v45, %v121_v44 }
  0x6e   :  { %124 = vst [vmem:[#allocation8] sm:$0x1] %v123_v46 }
  0x6f   :  { %213 = shalt.err (!%p210_p0)
}
  0x70   :  { %134 = dma.vmem_to_hbm [thread:$0]  %s132_s1, 16, %s259_s2, [#allocation5]  }
  0x71   :  { %226 = dma.done.wait [#allocation5], 16  }
  0x72   :  { %227 = vsyncadd [#allocation5], 4294967280 }
  0x73   :  { %138 = vsyncpa [#allocation4], 1 }
  0x74   :  { %139 = vsyncpa [#allocation7], 1 }
  0x75   :  { %140 = vsyncpa [#allocation5], 1 }

</bundles_post_ra>
